<compile_context>
chip_gen: v6e
topology: v6e:2x2x1
jax: 0.10.0
libtpu: 0.0.40
codegen_flags: <defaults>
</compile_context>

<pallas_src>
import functools

import jax
import jax.numpy as jnp
from jax.experimental import pallas as pl
from jax.experimental.pallas import tpu as pltpu


_MIN_GRID_STEPS = 8          # >= 2 TCs (v7x) x several pipeline stages on every gen
_SMALL_STREAM_LANES = 128    # (block_n, 1) tiles are lane-padded to 128 in VMEM


def _vmem_capacity_bytes():
    """Physical VMEM of the local TPU generation (conservative fallback)."""
    try:
        return int(pltpu.get_tpu_info().vmem_capacity_bytes)
    except Exception:
        return 64 * 1024 * 1024  # v7x-sized fallback: safe on every generation


def _pick_block_n(n, c, itemsize, vmem_bytes, n_small_streams):
    """Rows per tile from an explicit VMEM budget.

    Budget = 5/8 of physical VMEM, charged with:
      * 2x double-buffered input tile (lane-padded C),
      * ~3 tile-sized f32 temporaries (upcast / exp(x-m) / masked product),
      * 2x double-buffered lane-padded (block_n, 1) small streams
        (targets, optional weight, output).
    Then capped so the grid keeps >= _MIN_GRID_STEPS steps whenever tiles can
    stay at/above the minimum sublane tile height (pipelining + dual-TC on v7x).
    """
    min_rows = 16 if itemsize < 4 else 8
    c_pad = ((c + 127) // 128) * 128
    budget = (vmem_bytes * 5) // 8
    per_row = (c_pad * (2 * itemsize + 3 * 4)
               + n_small_streams * 2 * _SMALL_STREAM_LANES * 4)
    rows = budget // max(per_row, 1)
    rows = min(rows, 65536)
    # Never let the grid collapse to a single step.
    rows = min(rows, max(n // _MIN_GRID_STEPS, min_rows))
    if rows >= n:
        return n                      # tiny problem: one full block (always legal)
    return max(rows - rows % min_rows, min_rows)


def focal_loss_kernel(x_ref, t_ref, *rest, gamma, scale, has_weight):
    # x_ref : (block_n, C)  logits tile (f32 or bf16; upcast in-register)
    # t_ref : (block_n, 1)  int32 target class
    # wt_ref: (block_n, 1)  f32 class_weight[target]   (only when has_weight)
    # o_ref : (block_n, 1)  f32 per-sample focal loss
    if has_weight:
        wt_ref, o_ref = rest
    else:
        (o_ref,) = rest

    x = x_ref[...].astype(jnp.float32)
    if scale != 1.0:                    # static Python branch: elided for scale==1
        x = x * scale
    t = t_ref[...]

    # numerically stable log-sum-exp over classes (lane axis)
    m = jnp.max(x, axis=-1, keepdims=True)
    lse = m + jnp.log(jnp.sum(jnp.exp(x - m), axis=-1, keepdims=True))

    # logit of the target class via lane-iota compare + masked lane reduction
    col = jax.lax.broadcasted_iota(jnp.int32, x.shape, dimension=1)
    x_t = jnp.sum(jnp.where(col == t, x, 0.0), axis=-1, keepdims=True)

    # per-sample cross entropy (reduction='none'); weight applied per-sample
    ce = lse - x_t
    if has_weight:
        ce = ce * wt_ref[...]

    # focal modulation: p = exp(-ce); loss = (1 - p)**gamma * ce
    p = jnp.exp(-ce)
    base = jnp.maximum(1.0 - p, 0.0)    # guard pow(negative, non-integer) NaN
    if gamma == 0.0:
        loss = ce
    elif float(gamma).is_integer() and 0.0 < gamma <= 8.0:
        mod = base                      # static repeated multiply, no pow on EUP
        for _ in range(int(gamma) - 1):
            mod = mod * base
        loss = mod * ce
    else:
        loss = (base ** gamma) * ce
    o_ref[...] = loss.astype(o_ref.dtype)


def focal_loss_pallas(logits, targets, class_weight=None, *, gamma=0.0,
                      scale=1.0, block_n=None):
    """FocalLoss.forward(logits, targets): per-sample focal loss, shape (N,)."""
    n, c = logits.shape
    t2 = targets.astype(jnp.int32).reshape(n, 1)
    has_weight = class_weight is not None

    vmem = _vmem_capacity_bytes()
    n_small = 3 if has_weight else 2          # targets + output (+ weight)
    if block_n is None:
        block_n = _pick_block_n(n, c, jnp.dtype(logits.dtype).itemsize,
                                vmem, n_small)
    grid_n = pl.cdiv(n, block_n)

    in_specs = [
        pl.BlockSpec((block_n, c), lambda i: (i, 0)),   # logits tile
        pl.BlockSpec((block_n, 1), lambda i: (i, 0)),   # targets
    ]
    args = [logits, t2]
    if has_weight:
        # Pre-gather weight[target] from the tiny (C,) table on the XLA side:
        # removes a (bn, C) multiply and a lane reduction from the kernel.
        wt = class_weight.astype(jnp.float32)[targets].reshape(n, 1)
        in_specs.append(pl.BlockSpec((block_n, 1), lambda i: (i, 0)))
        args.append(wt)

    kernel = functools.partial(focal_loss_kernel, gamma=float(gamma),
                               scale=float(scale), has_weight=has_weight)
    out = pl.pallas_call(
        kernel,
        out_shape=jax.ShapeDtypeStruct((n, 1), jnp.float32),
        grid_spec=pltpu.PrefetchScalarGridSpec(
            num_scalar_prefetch=0,
            grid=(grid_n,),
            in_specs=in_specs,
            out_specs=pl.BlockSpec((block_n, 1), lambda i: (i, 0)),
        ),
        compiler_params=pltpu.CompilerParams(
            dimension_semantics=("parallel",),
            vmem_limit_bytes=int((vmem * 3) // 4),
        ),
    )(*args)
    return out.reshape(n)


def focal_loss_ref(logits, targets, class_weight=None, *, gamma=0.0, scale=1.0):
    """Pure-JAX reference mirroring the torch module's semantics."""
    x = logits.astype(jnp.float32) * scale
    logp = jax.nn.log_softmax(x, axis=-1)
    nll = -jnp.take_along_axis(logp, targets[:, None].astype(jnp.int32),
                               axis=-1)[:, 0]
    if class_weight is not None:
        nll = nll * class_weight.astype(jnp.float32)[targets]
    p = jnp.exp(-nll)
    return (1.0 - p) ** gamma * nll


if __name__ == "__main__":
    # Small, deterministic example: N=128 samples, C=32 classes.
    N, C = 128, 32
    gamma = 2.0
    scale = 2.0

    key = jax.random.PRNGKey(0)
    k_x, k_t, k_w = jax.random.split(key, 3)
    logits = jax.random.normal(k_x, (N, C), dtype=jnp.float32)
    targets = jax.random.randint(k_t, (N,), 0, C, dtype=jnp.int32)
    class_weight = 0.5 + jax.random.uniform(k_w, (C,), dtype=jnp.float32)

    # Weighted path (exercises the wt stream).
    out_w = focal_loss_pallas(logits, targets, class_weight,
                              gamma=gamma, scale=scale)
    out_w = jax.block_until_ready(out_w)
    ref_w = focal_loss_ref(logits, targets, class_weight,
                           gamma=gamma, scale=scale)
    assert out_w.shape == (N,)
    err_w = jnp.max(jnp.abs(out_w - ref_w))
    assert jnp.allclose(out_w, ref_w, atol=1e-5, rtol=1e-4), f"max err {err_w}"

    # Unweighted path (exercises the weight-free trace specialisation).
    out_u = focal_loss_pallas(logits, targets, None, gamma=gamma, scale=scale)
    out_u = jax.block_until_ready(out_u)
    ref_u = focal_loss_ref(logits, targets, None, gamma=gamma, scale=scale)
    err_u = jnp.max(jnp.abs(out_u - ref_u))
    assert jnp.allclose(out_u, ref_u, atol=1e-5, rtol=1e-4), f"max err {err_u}"

    print("KERNEL_OK")
</pallas_src>

<mosaic_0001>
module attributes {stable_mosaic.version = 11 : i64} {
  func.func @focal_loss_kernel(%arg0: i32, %arg1: memref<16x32xf32, #tpu.memory_space<vmem>>, %arg2: memref<16x1xi32, #tpu.memory_space<vmem>>, %arg3: memref<16x1xf32, #tpu.memory_space<vmem>>, %arg4: memref<16x1xf32, #tpu.memory_space<vmem>>) attributes {dimension_semantics = [#tpu.dimension_semantics<parallel>], iteration_bounds = array<i64: 8>, scalar_prefetch = 0 : i64, scratch_operands = 0 : i64, tpu.core_type = #tpu.core_type<tc>, window_params = [{transform_indices = @transform_0, window_bounds = array<i64: 16, 32>}, {transform_indices = @transform_1, window_bounds = array<i64: 16, 1>}, {transform_indices = @transform_2, window_bounds = array<i64: 16, 1>}, {transform_indices = @transform_3, window_bounds = array<i64: 16, 1>}]} {
    %c0 = arith.constant 0 : index
    %c0_0 = arith.constant 0 : index
    %0 = vector.load %arg1[%c0, %c0_0] : memref<16x32xf32, #tpu.memory_space<vmem>>, vector<16x32xf32>
    %cst = arith.constant 2.000000e+00 : f32
    %1 = vector.broadcast %cst : f32 to vector<16x32xf32>
    %2 = arith.mulf %0, %1 : vector<16x32xf32>
    %c0_1 = arith.constant 0 : index
    %c0_2 = arith.constant 0 : index
    %3 = vector.load %arg2[%c0_1, %c0_2] : memref<16x1xi32, #tpu.memory_space<vmem>>, vector<16x1xi32>
    %cst_3 = arith.constant dense<0xFF800000> : vector<16xf32>
    %4 = vector.multi_reduction <maximumf>, %2, %cst_3 [1] : vector<16x32xf32> to vector<16xf32>
    %5 = vector.shape_cast %4 : vector<16xf32> to vector<16x1xf32>
    %6 = vector.broadcast %5 : vector<16x1xf32> to vector<16x32xf32>
    %7 = arith.subf %2, %6 : vector<16x32xf32>
    %8 = math.exp %7 : vector<16x32xf32>
    %cst_4 = arith.constant dense<0.000000e+00> : vector<16xf32>
    %9 = vector.multi_reduction <add>, %8, %cst_4 [1] : vector<16x32xf32> to vector<16xf32>
    %10 = vector.shape_cast %9 : vector<16xf32> to vector<16x1xf32>
    %11 = math.log %10 : vector<16x1xf32>
    %12 = arith.addf %5, %11 : vector<16x1xf32>
    %13 = tpu.iota {dimensions = array<i32: 1>} : vector<16x32xi32>
    %14 = vector.broadcast %3 : vector<16x1xi32> to vector<16x32xi32>
    %15 = arith.cmpi eq, %13, %14 : vector<16x32xi32>
    %cst_5 = arith.constant 0.000000e+00 : f32
    %16 = vector.broadcast %cst_5 : f32 to vector<16x32xf32>
    %17 = arith.select %15, %2, %16 : vector<16x32xi1>, vector<16x32xf32>
    %cst_6 = arith.constant dense<0.000000e+00> : vector<16xf32>
    %18 = vector.multi_reduction <add>, %17, %cst_6 [1] : vector<16x32xf32> to vector<16xf32>
    %19 = vector.shape_cast %18 : vector<16xf32> to vector<16x1xf32>
    %20 = arith.subf %12, %19 : vector<16x1xf32>
    %c0_7 = arith.constant 0 : index
    %c0_8 = arith.constant 0 : index
    %21 = vector.load %arg3[%c0_7, %c0_8] : memref<16x1xf32, #tpu.memory_space<vmem>>, vector<16x1xf32>
    %22 = arith.mulf %20, %21 : vector<16x1xf32>
    %cst_9 = arith.constant 0.000000e+00 : f32
    %23 = vector.broadcast %cst_9 : f32 to vector<16x1xf32>
    %24 = arith.subf %23, %22 : vector<16x1xf32>
    %25 = math.exp %24 : vector<16x1xf32>
    %cst_10 = arith.constant 1.000000e+00 : f32
    %26 = vector.broadcast %cst_10 : f32 to vector<16x1xf32>
    %27 = arith.subf %26, %25 : vector<16x1xf32>
    %cst_11 = arith.constant 0.000000e+00 : f32
    %28 = vector.broadcast %cst_11 : f32 to vector<16x1xf32>
    %29 = arith.maximumf %27, %28 : vector<16x1xf32>
    %30 = arith.mulf %29, %29 : vector<16x1xf32>
    %31 = arith.mulf %30, %22 : vector<16x1xf32>
    %c0_12 = arith.constant 0 : index
    %c0_13 = arith.constant 0 : index
    %32 = vector.load %arg4[%c0_12, %c0_13] : memref<16x1xf32, #tpu.memory_space<vmem>>, vector<16x1xf32>
    tpu.vector_store %arg4[%c0_12, %c0_13], %31 {strides = array<i32>} : memref<16x1xf32, #tpu.memory_space<vmem>>, vector<16x1xf32>,
    return
  }
  func.func @transform_0(%arg0: i32) -> (i32, i32) {
    %c0_i32 = arith.constant 0 : i32
    %c0_i32_0 = arith.constant 0 : i32
    return %arg0, %c0_i32 : i32, i32
  }
  func.func @transform_1(%arg0: i32) -> (i32, i32) {
    %c0_i32 = arith.constant 0 : i32
    %c0_i32_0 = arith.constant 0 : i32
    return %arg0, %c0_i32 : i32, i32
  }
  func.func @transform_2(%arg0: i32) -> (i32, i32) {
    %c0_i32 = arith.constant 0 : i32
    %c0_i32_0 = arith.constant 0 : i32
    return %arg0, %c0_i32 : i32, i32
  }
  func.func @transform_3(%arg0: i32) -> (i32, i32) {
    %c0_i32 = arith.constant 0 : i32
    %c0_i32_0 = arith.constant 0 : i32
    return %arg0, %c0_i32 : i32, i32
  }
}

</mosaic_0001>

<bundles_post_ra>
// kernel: tpu_custom_call.1
= control target key start
LH: loop header
LB: loop body
LE: loop exit
PB: predicated region body
PF: predicated region fallthrough
CT: control target
= control target key end

     0   :  { %s437_s12 = smov 0   ;;  %s472_s0 = inlined_call_operand.vmem [shape: f32[128,32], index: 0, kind: input, shape index: {}]   ;;  %s473_s1 = inlined_call_operand.vmem [shape: s32[128,1], index: 1, kind: input, shape index: {}]   ;;  %s474_s2 = inlined_call_operand.vmem [shape: f32[128,1], index: 2, kind: input, shape index: {}]   ;;  %s475_s3 = inlined_call_operand.vmem [shape: f32[128,1], index: 3, kind: output, shape index: {}]  }
   0x1 LB: > { %s370_s13 = sadd.s32 4294967295, %s414_s12   ;;  %p374_p0 = scmp.ge.s32.totalorder %s414_s12, 1  ;;  %s414_s12 = sphi %s437_s12, %s13_s12  }
   0x2   : > { %p160_p1 = scmp.lt.s32.totalorder %s414_s12, 9 }
   0x4   : > { %p161_p2 = pnand %p374_p0, %p160_p1 }
   0x5   : > { %s375_s14 = sshll.u32 (!%p161_p2), %s370_s13, 1 }
   0x6   : > { %164 = sbr.rel (%p161_p2) target bundleno = 366 (0x16e), region = 32  ;;  %p195_p3 = scmp.lt.s32.totalorder (!%p161_p2), %s375_s14, 15 }
   0xb   : > { %v416_v0 = vmov 0   ;;  %s477_s14 = smov (!%p195_p3, %s375_s14), 15  ;;  %vm224_vm0 = vcmask 261120   ;;  %v249_v15 = vlaneseq  ;;  %vm287_vm3 = vcmask 7168  }
   0xc   : > { %394 = vset.pattern.permute.xlu1 %v416_v0  ;;  %395 = vset.pattern.permute.xlu0 %v416_v0  ;;  %s445_s15 = sshll.u32 %s477_s14, 3 }
   0xd   : > { %s198_s18 = scalar_lea.vmem %s472_s0, %s445_s15  ;;  %s204_s21 = scalar_lea.vmem %s473_s1, %s445_s15  ;;  %v250_v17 = vand.u32 127, %v249_v15 }
   0xe   : > { %v218_v1 = vld [vmem:[%s198_s18] sm:$0xff]  ;;  %v219_v2 = vld [vmem:[%s198_s18 + $0x8] sm:$0xff]  ;;  %s210_s24 = scalar_lea.vmem %s474_s2, %s445_s15  ;;  %s216_s27 = scalar_lea.vmem %s475_s3, %s445_s15 }
   0xf   : > { %v222_v3 = vld [vmem:[%s204_s21] sm:$0xff]  ;;  %v220_v4 = vmul.f32 2.0, %v218_v1  ;;  %v221_v5 = vmul.f32 2.0, %v219_v2  ;;  %v223_v6 = vld [vmem:[%s204_s21 + $0x8] sm:$0xff] }
  0x10   : > { %252 = vperm.xlu1 %394, %v222_v3   ;;  %v269_v34 = vld [vmem:[%s210_s24] sm:$0xff]  ;;  %v270_v39 = vld [vmem:[%s210_s24 + $0x8] sm:$0xff] }
  0x11   : > { %v225_v7 = vsel %vm224_vm0, %v220_v4, -inf  ;;  %v228_v8 = vsel %vm224_vm0, %v221_v5, -inf }
  0x12   : > { %226 = vmax.xlane.f32.xlu0 %v225_v7 }
  0x14   : > { %255 = vperm.xlu1 %394, %v223_v6  }
  0x16   : > { %229 = vmax.xlane.f32.xlu0 %v228_v8 }
  0x8b   : > { %v253_v16 = vpop.permute.xlu1 %252 }
  0x8c   : > { %vm257_vm1 = vcmp.eq.s32.totalorder %v250_v17, %v253_v16 }
  0x8d   : > { %v259_v20 = vsel %vm257_vm1, %v220_v4, 0.0 }
  0x8e   : > { %v261_v22 = vsel %vm224_vm0, %v259_v20, 0.0 }
  0x8f   : > { %v256_v18 = vpop.permute.xlu1 %255 }
  0x90   : > { %vm258_vm2 = vcmp.eq.s32.totalorder %v250_v17, %v256_v18 }
  0x91   : > { %v260_v24 = vsel %vm258_vm2, %v221_v5, 0.0 }
  0x92   : > { %v264_v26 = vsel %vm224_vm0, %v260_v24, 0.0 }
  0x9b   : > { %v227_v9 = vpop.xlane.xlu0 %226 }
  0x9c   : > { %v231_v10 = vsub.f32 %v220_v4, %v227_v9 }
  0x9e   : > { %v233_v11 = vmul.f32 1.442695, %v231_v10 }
  0x9f   : > { %v230_v12 = vpop.xlane.xlu0 %229 }
  0xa0   : > { %396 = vpow2.f32 %v233_v11  ;;  %v232_v13 = vsub.f32 %v221_v5, %v230_v12 }
  0xa2   : > { %v235_v14 = vmul.f32 1.442695, %v232_v13 }
  0xa4   : > { %398 = vpow2.f32 %v235_v14 }
  0xad   : > { %v397_v19 = vpop.eup %396 }
  0xae   : > { %v237_v21 = vsel %vm224_vm0, %v397_v19, 0.0 }
  0xaf   : > { %238 = vadd.xlane.f32.xlu0 %v237_v21 }
  0xb1   : > { %v399_v23 = vpop.eup %398 }
  0xb2   : > { %v240_v25 = vsel %vm224_vm0, %v399_v23, 0.0 }
  0xb3   : > { %241 = vadd.xlane.f32.xlu1 %v240_v25  ;;  %262 = vadd.xlane.f32.xlu0 %v261_v22 }
  0xb7   : > { %265 = vadd.xlane.f32.xlu0 %v264_v26 }
 0x138   : > { %v239_v27 = vpop.xlane.xlu0 %238 }
 0x139   : > { %400 = vlog2.f32 %v239_v27 }
 0x13c   : > { %v242_v28 = vpop.xlane.xlu1 %241  ;;  %v263_v31 = vpop.xlane.xlu0 %262 }
 0x13d   : > { %402 = vlog2.f32 %v242_v28 }
 0x140   : > { %v266_v40 = vpop.xlane.xlu0 %265 }
 0x146   : > { %v401_v29 = vpop.eup %400 }
 0x147   : > { %v244_v30 = vmul.f32 0.6931472, %v401_v29 }
 0x149   : > { %v247_v32 = vadd.f32 %v244_v30, %v227_v9 }
 0x14a   : > { %v403_v33 = vpop.eup %402 }
 0x14b   : > { %v246_v35 = vmul.f32 0.6931472, %v403_v33  ;;  %v267_v36 = vsub.f32 %v247_v32, %v263_v31 }
 0x14d   : > { %v271_v37 = vmul.f32 %v269_v34, %v267_v36  ;;  %v248_v38 = vadd.f32 %v246_v35, %v230_v12 }
 0x14f   : > { %v273_v41 = vsub.f32 0.0, %v271_v37  ;;  %v268_v42 = vsub.f32 %v248_v38, %v266_v40 }
 0x151   : > { %v275_v43 = vmul.f32 1.442695, %v273_v41  ;;  %v272_v44 = vmul.f32 %v270_v39, %v268_v42 }
 0x153   : > { %404 = vpow2.f32 %v275_v43  ;;  %v274_v45 = vsub.f32 0.0, %v272_v44 }
 0x155   : > { %v277_v46 = vmul.f32 1.442695, %v274_v45 }
 0x157   : > { %406 = vpow2.f32 %v277_v46 }
 0x160   : > { %v405_v47 = vpop.eup %404 }
 0x161   : > { %v279_v48 = vsub.f32 1.0, %v405_v47 }
 0x163   : > { %v281_v49 = vmax.f32 %v279_v48, 0.0 }
 0x164   : > { %v407_v50 = vpop.eup %406 }
 0x165   : > { %v283_v51 = vmul.f32 %v281_v49, %v281_v49  ;;  %v280_v52 = vsub.f32 1.0, %v407_v50 }
 0x167   : > { %v285_v53 = vmul.f32 %v283_v51, %v271_v37  ;;  %v282_v54 = vmax.f32 %v280_v52, 0.0 }
 0x169   : > { %288 = vst.msk [vmem:[%s216_s27] sm:$0xff] %vm287_vm3, %v285_v53  ;;  %v284_v55 = vmul.f32 %v282_v54, %v282_v54 }
 0x16b   : > { %v286_v56 = vmul.f32 %v284_v55, %v272_v44 }
 0x16d   : > { %289 = vst.msk [vmem:[%s216_s27 + $0x8] sm:$0xff] %vm287_vm3, %v286_v56 }
 0x16e PF: > { %s13_s12 = sadd.s32 1, %s414_s12  }
 0x16f   : > { %p10_p4 = scmp.ge.s32.totalorder %s13_s12, 10  }
 0x171   :  { %12 = sbr.rel (!%p10_p4) target bundleno = 1 (0x1), region = 68 }

</bundles_post_ra>
